<compile_context>
chip_gen: v5e
topology: v5e:2x2
jax: 0.10.0
libtpu: 0.0.40
codegen_flags: <defaults>
</compile_context>

<pallas_src>
import math

import jax
import jax.numpy as jnp
import numpy as np
from jax.experimental import pallas as pl
from jax.experimental.pallas import tpu as pltpu
from jax.scipy.linalg import block_diag

# ---------------- configuration (the "args" of OBS_W) ----------------
B, T = 2, 8                 # batch, time  -> bs = B*T
N_AGENTS = 4                # args.n_agents
OBS_SHAPE = 16              # args.obs_shape
STATE_DIM = 32              # prod(args.state_shape)
HYPERNET_EMB = 32           # args.hypernet_emb
EMB_DIM = 32                # args.attention_dim
N_HEAD = 2                  # args.n_head

BS = B * T
MAX_TILE_BS = 512           # multiple of 128; batches <= this run as a single grid step


# ---------------- Pallas kernel ----------------
def obs_w_kernel(states_ref, obs_ref,
                 wq1_ref, bq1_ref, wq2_ref, wk_ref, ssum_ref,
                 ww1_ref, bw1_ref, ww2_ref, bw2_ref,
                 out_ref):
    sT = states_ref[...]                       # (S,   TB)  f32, batch on lanes
    obsT = obs_ref[...]                        # (N*O, TB)  f32

    # ---- head gate: |W2 . relu(W1 . s + b1) + b2|  -> (H, TB) ----
    h1 = jnp.maximum(
        jnp.dot(ww1_ref[...], sT, preferred_element_type=jnp.float32) + bw1_ref[...],
        0.0)
    whT = jnp.abs(
        jnp.dot(ww2_ref[...], h1, preferred_element_type=jnp.float32) + bw2_ref[...])

    # ---- fused query hypernet for ALL heads (one matmul chain) ----
    q1 = jnp.maximum(
        jnp.dot(wq1_ref[...], sT, preferred_element_type=jnp.float32) + bq1_ref[...],
        0.0)                                                        # (H*hyp, TB)
    q = jnp.dot(wq2_ref[...], q1, preferred_element_type=jnp.float32)   # (H*E,   TB)
    qk = jnp.dot(wk_ref[...], q, preferred_element_type=jnp.float32)    # (H*N*O, TB)

    scale = 1.0 / math.sqrt(EMB_DIM)
    inv_heads = 1.0 / N_HEAD
    ssum = ssum_ref[...]                       # (N, N*O) group-sum matrix

    acc = jnp.zeros(out_ref.shape, jnp.float32)        # (N, TB)
    blk = N_AGENTS * OBS_SHAPE
    for h in range(N_HEAD):                            # static unroll over heads
        qk_h = qk[h * blk:(h + 1) * blk, :]            # (N*O, TB) sublane slice
        # score[a, b] = sum_o obs[b, a, o] * qk[b, h, o]   (group-sum matmul)
        sc = jnp.dot(ssum, obsT * qk_h,
                     preferred_element_type=jnp.float32) * scale        # (N, TB)

        # softmax over agents (sublane axis), batch stays lane-dense
        sc = sc - jnp.max(sc, axis=0, keepdims=True)
        p = jnp.exp(sc)
        p = p * pl.reciprocal(jnp.sum(p, axis=0, keepdims=True), approx=True)

        if N_HEAD > 1:
            p = p * (whT[h:h + 1, :] * inv_heads)      # gate * (1/H) folded together
        else:
            p = p * inv_heads
        acc = acc + p

    out_ref[...] = acc.astype(out_ref.dtype)           # lane-dense (N, TB) store


# ---------------- weight preparation (wrapper-side layout plumbing) ----------------
def _prep_weights(params):
    H, N, O, E, HYP, S = N_HEAD, N_AGENTS, OBS_SHAPE, EMB_DIM, HYPERNET_EMB, STATE_DIM

    # fused first query layer:  rows (h*hyp + j) <- wq1[h, j, :]
    wq1_f = params['wq1'].reshape(H * HYP, S).astype(jnp.float32)       # (H*hyp, S)
    bq1_c = params['bq1'].reshape(H * HYP, 1).astype(jnp.float32)       # (H*hyp, 1)

    # fused second query layer: block-diagonal over heads
    wq2_blk = block_diag(*[params['wq2'][h] for h in range(H)]).astype(jnp.float32)  # (H*E, H*hyp)

    # fused key projection, replicated across the N agent slots of each head:
    # rows (h*N + a)*O + o , cols h*E + e  <-  wk[h, e, o]
    wk_rep = block_diag(
        *[jnp.tile(params['wk'][h].T, (N, 1)) for h in range(H)]).astype(jnp.float32)  # (H*N*O, H*E)

    # per-agent group-sum matrix for the score reduction
    ssum = jnp.kron(jnp.eye(N, dtype=jnp.float32),
                    jnp.ones((1, O), jnp.float32))                      # (N, N*O)

    ww1 = params['ww1'].astype(jnp.float32)                             # (hyp, S)
    bw1_c = params['bw1'].reshape(HYP, 1).astype(jnp.float32)           # (hyp, 1)
    ww2 = params['ww2'].astype(jnp.float32)                             # (H, hyp)
    bw2_c = params['bw2'].reshape(H, 1).astype(jnp.float32)             # (H, 1)

    return (wq1_f, bq1_c, wq2_blk, wk_rep, ssum, ww1, bw1_c, ww2, bw2_c)


# ---------------- wrapper ----------------
def obs_w_forward(states, obs, params, max_tile_bs=MAX_TILE_BS):
    """states: (bs, STATE_DIM), obs: (bs, N_AGENTS, OBS_SHAPE) -> (bs, N_AGENTS)."""
    bs = states.shape[0]

    # batch on the lane (last) axis; obs flattened to (N*O, bs) lane-dense slab
    statesT = states.astype(jnp.float32).T                              # (S, bs)
    obsT = obs.reshape(bs, N_AGENTS * OBS_SHAPE).astype(jnp.float32).T  # (N*O, bs)

    if bs <= max_tile_bs:
        tile_bs, bs_pad = bs, bs               # single grid step, full-extent blocks
    else:
        tile_bs = max_tile_bs                  # multiple of 128 -> aligned lane blocks
        bs_pad = pl.cdiv(bs, tile_bs) * tile_bs
        statesT = jnp.pad(statesT, ((0, 0), (0, bs_pad - bs)))
        obsT = jnp.pad(obsT, ((0, 0), (0, bs_pad - bs)))

    weights = _prep_weights(params)

    def batch_spec(rows):
        return pl.BlockSpec((rows, tile_bs), lambda i: (0, i))

    def full_spec(arr):
        return pl.BlockSpec(arr.shape, lambda i: (0, 0))

    out = pl.pallas_call(
        obs_w_kernel,
        out_shape=jax.ShapeDtypeStruct((N_AGENTS, bs_pad), jnp.float32),
        grid_spec=pltpu.PrefetchScalarGridSpec(
            num_scalar_prefetch=0,
            grid=(bs_pad // tile_bs,),
            in_specs=[batch_spec(STATE_DIM),
                      batch_spec(N_AGENTS * OBS_SHAPE)]
                     + [full_spec(w) for w in weights],
            out_specs=pl.BlockSpec((N_AGENTS, tile_bs), lambda i: (0, i)),
        ),
        compiler_params=pltpu.CompilerParams(dimension_semantics=("parallel",)),
    )(statesT, obsT, *weights)

    return out[:, :bs].T                       # back to (bs, N_AGENTS)


# ---------------- pure-JAX reference (mirrors the PyTorch forward) ----------------
def obs_w_reference(states, obs, params):
    h1 = jnp.maximum(states @ params['ww1'].T + params['bw1'], 0.0)
    wh = jnp.abs(h1 @ params['ww2'].T + params['bw2'])               # (bs, H)
    heads = []
    for h in range(N_HEAD):
        q1 = jnp.maximum(states @ params['wq1'][h].T + params['bq1'][h], 0.0)
        q = q1 @ params['wq2'][h].T                                  # (bs, E)
        k = jnp.einsum('bno,eo->bne', obs, params['wk'][h])          # (bs, N, E)
        sc = jnp.einsum('be,bne->bn', q, k) / np.sqrt(EMB_DIM)
        p = jax.nn.softmax(sc, axis=-1)
        if N_HEAD > 1:
            p = p * wh[:, h:h + 1]
        heads.append(p)
    return jnp.mean(jnp.stack(heads, axis=1), axis=1)                # (bs, N)


if __name__ == "__main__":
    key = jax.random.PRNGKey(0)
    keys = jax.random.split(key, 10)

    # deterministic synthetic parameters (PyTorch Linear convention: weight = (out, in))
    params = {
        'wq1': 0.1 * jax.random.normal(keys[0], (N_HEAD, HYPERNET_EMB, STATE_DIM), jnp.float32),
        'bq1': 0.1 * jax.random.normal(keys[1], (N_HEAD, HYPERNET_EMB), jnp.float32),
        'wq2': 0.1 * jax.random.normal(keys[2], (N_HEAD, EMB_DIM, HYPERNET_EMB), jnp.float32),
        'wk':  0.1 * jax.random.normal(keys[3], (N_HEAD, EMB_DIM, OBS_SHAPE), jnp.float32),
        'ww1': 0.1 * jax.random.normal(keys[4], (HYPERNET_EMB, STATE_DIM), jnp.float32),
        'bw1': 0.1 * jax.random.normal(keys[5], (HYPERNET_EMB,), jnp.float32),
        'ww2': 0.1 * jax.random.normal(keys[6], (N_HEAD, HYPERNET_EMB), jnp.float32),
        'bw2': 0.1 * jax.random.normal(keys[7], (N_HEAD,), jnp.float32),
    }

    states = jax.random.normal(keys[8], (B, T, STATE_DIM), jnp.float32)
    obs = jax.random.normal(keys[9], (B, T, N_AGENTS, OBS_SHAPE), jnp.float32)

    # glue: flatten (b, t) -> bs, exactly like the torch reshape
    states_flat = states.reshape(BS, STATE_DIM)
    obs_flat = obs.reshape(BS, N_AGENTS, OBS_SHAPE)

    out = obs_w_forward(states_flat, obs_flat, params)
    out = jax.block_until_ready(out)

    ref = obs_w_reference(states_flat, obs_flat, params)
    assert out.shape == (BS, N_AGENTS)
    # tolerance accounts for the EUP approx-reciprocal softmax normalization
    np.testing.assert_allclose(np.asarray(out), np.asarray(ref), rtol=5e-3, atol=1e-5)

    print("KERNEL_OK")
</pallas_src>

<mosaic_0001>
module attributes {stable_mosaic.version = 11 : i64} {
  func.func @obs_w_kernel(%arg0: i32, %arg1: memref<32x16xf32, #tpu.memory_space<vmem>>, %arg2: memref<64x16xf32, #tpu.memory_space<vmem>>, %arg3: memref<64x32xf32, #tpu.memory_space<vmem>>, %arg4: memref<64x1xf32, #tpu.memory_space<vmem>>, %arg5: memref<64x64xf32, #tpu.memory_space<vmem>>, %arg6: memref<128x64xf32, #tpu.memory_space<vmem>>, %arg7: memref<4x64xf32, #tpu.memory_space<vmem>>, %arg8: memref<32x32xf32, #tpu.memory_space<vmem>>, %arg9: memref<32x1xf32, #tpu.memory_space<vmem>>, %arg10: memref<2x32xf32, #tpu.memory_space<vmem>>, %arg11: memref<2x1xf32, #tpu.memory_space<vmem>>, %arg12: memref<4x16xf32, #tpu.memory_space<vmem>>) attributes {dimension_semantics = [#tpu.dimension_semantics<parallel>], iteration_bounds = array<i64: 1>, scalar_prefetch = 0 : i64, scratch_operands = 0 : i64, tpu.core_type = #tpu.core_type<tc>, window_params = [{transform_indices = @transform_0, window_bounds = array<i64: 32, 16>}, {transform_indices = @transform_1, window_bounds = array<i64: 64, 16>}, {pipeline_mode = #tpu.pipeline_mode<synchronous>, transform_indices = @transform_2, window_bounds = array<i64: 64, 32>}, {pipeline_mode = #tpu.pipeline_mode<synchronous>, transform_indices = @transform_3, window_bounds = array<i64: 64, 1>}, {pipeline_mode = #tpu.pipeline_mode<synchronous>, transform_indices = @transform_4, window_bounds = array<i64: 64, 64>}, {pipeline_mode = #tpu.pipeline_mode<synchronous>, transform_indices = @transform_5, window_bounds = array<i64: 128, 64>}, {pipeline_mode = #tpu.pipeline_mode<synchronous>, transform_indices = @transform_6, window_bounds = array<i64: 4, 64>}, {pipeline_mode = #tpu.pipeline_mode<synchronous>, transform_indices = @transform_7, window_bounds = array<i64: 32, 32>}, {pipeline_mode = #tpu.pipeline_mode<synchronous>, transform_indices = @transform_8, window_bounds = array<i64: 32, 1>}, {pipeline_mode = #tpu.pipeline_mode<synchronous>, transform_indices = @transform_9, window_bounds = array<i64: 2, 32>}, {pipeline_mode = #tpu.pipeline_mode<synchronous>, transform_indices = @transform_10, window_bounds = array<i64: 2, 1>}, {transform_indices = @transform_11, window_bounds = array<i64: 4, 16>}]} {
    %c0 = arith.constant 0 : index
    %c0_0 = arith.constant 0 : index
    %0 = vector.load %arg1[%c0, %c0_0] : memref<32x16xf32, #tpu.memory_space<vmem>>, vector<32x16xf32>
    %c0_1 = arith.constant 0 : index
    %c0_2 = arith.constant 0 : index
    %1 = vector.load %arg2[%c0_1, %c0_2] : memref<64x16xf32, #tpu.memory_space<vmem>>, vector<64x16xf32>
    %c0_3 = arith.constant 0 : index
    %c0_4 = arith.constant 0 : index
    %2 = vector.load %arg8[%c0_3, %c0_4] : memref<32x32xf32, #tpu.memory_space<vmem>>, vector<32x32xf32>
    %cst = arith.constant dense<0.000000e+00> : vector<32x16xf32>
    %3 = tpu.matmul %2, %0, %cst {dimension_numbers = #tpu.dot_dimension_numbers<[1], [0], [0], [1], [0, 0, 1, 1], [], []>} : vector<32x32xf32>, vector<32x16xf32>, vector<32x16xf32> -> vector<32x16xf32>
    %c0_5 = arith.constant 0 : index
    %c0_6 = arith.constant 0 : index
    %4 = vector.load %arg9[%c0_5, %c0_6] : memref<32x1xf32, #tpu.memory_space<vmem>>, vector<32x1xf32>
    %5 = vector.broadcast %4 : vector<32x1xf32> to vector<32x16xf32>
    %6 = arith.addf %3, %5 : vector<32x16xf32>
    %cst_7 = arith.constant 0.000000e+00 : f32
    %7 = vector.broadcast %cst_7 : f32 to vector<32x16xf32>
    %8 = arith.maximumf %6, %7 : vector<32x16xf32>
    %c0_8 = arith.constant 0 : index
    %c0_9 = arith.constant 0 : index
    %9 = vector.load %arg10[%c0_8, %c0_9] : memref<2x32xf32, #tpu.memory_space<vmem>>, vector<2x32xf32>
    %cst_10 = arith.constant dense<0.000000e+00> : vector<2x16xf32>
    %10 = tpu.matmul %9, %8, %cst_10 {dimension_numbers = #tpu.dot_dimension_numbers<[1], [0], [0], [1], [0, 0, 1, 1], [], []>} : vector<2x32xf32>, vector<32x16xf32>, vector<2x16xf32> -> vector<2x16xf32>
    %c0_11 = arith.constant 0 : index
    %c0_12 = arith.constant 0 : index
    %11 = vector.load %arg11[%c0_11, %c0_12] : memref<2x1xf32, #tpu.memory_space<vmem>>, vector<2x1xf32>
    %12 = vector.broadcast %11 : vector<2x1xf32> to vector<2x16xf32>
    %13 = arith.addf %10, %12 : vector<2x16xf32>
    %14 = math.absf %13 : vector<2x16xf32>
    %c0_13 = arith.constant 0 : index
    %c0_14 = arith.constant 0 : index
    %15 = vector.load %arg3[%c0_13, %c0_14] : memref<64x32xf32, #tpu.memory_space<vmem>>, vector<64x32xf32>
    %cst_15 = arith.constant dense<0.000000e+00> : vector<64x16xf32>
    %16 = tpu.matmul %15, %0, %cst_15 {dimension_numbers = #tpu.dot_dimension_numbers<[1], [0], [0], [1], [0, 0, 1, 1], [], []>} : vector<64x32xf32>, vector<32x16xf32>, vector<64x16xf32> -> vector<64x16xf32>
    %c0_16 = arith.constant 0 : index
    %c0_17 = arith.constant 0 : index
    %17 = vector.load %arg4[%c0_16, %c0_17] : memref<64x1xf32, #tpu.memory_space<vmem>>, vector<64x1xf32>
    %18 = vector.broadcast %17 : vector<64x1xf32> to vector<64x16xf32>
    %19 = arith.addf %16, %18 : vector<64x16xf32>
    %cst_18 = arith.constant 0.000000e+00 : f32
    %20 = vector.broadcast %cst_18 : f32 to vector<64x16xf32>
    %21 = arith.maximumf %19, %20 : vector<64x16xf32>
    %c0_19 = arith.constant 0 : index
    %c0_20 = arith.constant 0 : index
    %22 = vector.load %arg5[%c0_19, %c0_20] : memref<64x64xf32, #tpu.memory_space<vmem>>, vector<64x64xf32>
    %cst_21 = arith.constant dense<0.000000e+00> : vector<64x16xf32>
    %23 = tpu.matmul %22, %21, %cst_21 {dimension_numbers = #tpu.dot_dimension_numbers<[1], [0], [0], [1], [0, 0, 1, 1], [], []>} : vector<64x64xf32>, vector<64x16xf32>, vector<64x16xf32> -> vector<64x16xf32>
    %c0_22 = arith.constant 0 : index
    %c0_23 = arith.constant 0 : index
    %24 = vector.load %arg6[%c0_22, %c0_23] : memref<128x64xf32, #tpu.memory_space<vmem>>, vector<128x64xf32>
    %cst_24 = arith.constant dense<0.000000e+00> : vector<128x16xf32>
    %25 = tpu.matmul %24, %23, %cst_24 {dimension_numbers = #tpu.dot_dimension_numbers<[1], [0], [0], [1], [0, 0, 1, 1], [], []>} : vector<128x64xf32>, vector<64x16xf32>, vector<128x16xf32> -> vector<128x16xf32>
    %c0_25 = arith.constant 0 : index
    %c0_26 = arith.constant 0 : index
    %26 = vector.load %arg7[%c0_25, %c0_26] : memref<4x64xf32, #tpu.memory_space<vmem>>, vector<4x64xf32>
    %cst_27 = arith.constant 0.000000e+00 : f32
    %27 = vector.broadcast %cst_27 : f32 to vector<4x16xf32>
    %28 = vector.extract_strided_slice %25 {offsets = [0, 0], sizes = [64, 16], strides = [1, 1]} : vector<128x16xf32> to vector<64x16xf32>
    %29 = arith.mulf %1, %28 : vector<64x16xf32>
    %cst_28 = arith.constant dense<0.000000e+00> : vector<4x16xf32>
    %30 = tpu.matmul %26, %29, %cst_28 {dimension_numbers = #tpu.dot_dimension_numbers<[1], [0], [0], [1], [0, 0, 1, 1], [], []>} : vector<4x64xf32>, vector<64x16xf32>, vector<4x16xf32> -> vector<4x16xf32>
    %cst_29 = arith.constant 0.176776692 : f32
    %31 = vector.broadcast %cst_29 : f32 to vector<4x16xf32>
    %32 = arith.mulf %30, %31 : vector<4x16xf32>
    %cst_30 = arith.constant dense<0xFF800000> : vector<16xf32>
    %33 = vector.multi_reduction <maximumf>, %32, %cst_30 [0] : vector<4x16xf32> to vector<16xf32>
    %34 = vector.shape_cast %33 : vector<16xf32> to vector<1x16xf32>
    %35 = vector.broadcast %34 : vector<1x16xf32> to vector<4x16xf32>
    %36 = arith.subf %32, %35 : vector<4x16xf32>
    %37 = math.exp %36 : vector<4x16xf32>
    %cst_31 = arith.constant dense<0.000000e+00> : vector<16xf32>
    %38 = vector.multi_reduction <add>, %37, %cst_31 [0] : vector<4x16xf32> to vector<16xf32>
    %39 = vector.shape_cast %38 : vector<16xf32> to vector<1x16xf32>
    %40 = tpu.reciprocal %39 {approx = true} : vector<1x16xf32> -> vector<1x16xf32>
    %41 = vector.broadcast %40 : vector<1x16xf32> to vector<4x16xf32>
    %42 = arith.mulf %37, %41 : vector<4x16xf32>
    %43 = vector.extract_strided_slice %14 {offsets = [0, 0], sizes = [1, 16], strides = [1, 1]} : vector<2x16xf32> to vector<1x16xf32>
    %cst_32 = arith.constant 5.000000e-01 : f32
    %44 = vector.broadcast %cst_32 : f32 to vector<1x16xf32>
    %45 = arith.mulf %43, %44 : vector<1x16xf32>
    %46 = vector.broadcast %45 : vector<1x16xf32> to vector<4x16xf32>
    %47 = arith.mulf %42, %46 : vector<4x16xf32>
    %48 = arith.addf %27, %47 : vector<4x16xf32>
    %49 = vector.extract_strided_slice %25 {offsets = [64, 0], sizes = [64, 16], strides = [1, 1]} : vector<128x16xf32> to vector<64x16xf32>
    %50 = arith.mulf %1, %49 : vector<64x16xf32>
    %cst_33 = arith.constant dense<0.000000e+00> : vector<4x16xf32>
    %51 = tpu.matmul %26, %50, %cst_33 {dimension_numbers = #tpu.dot_dimension_numbers<[1], [0], [0], [1], [0, 0, 1, 1], [], []>} : vector<4x64xf32>, vector<64x16xf32>, vector<4x16xf32> -> vector<4x16xf32>
    %cst_34 = arith.constant 0.176776692 : f32
    %52 = vector.broadcast %cst_34 : f32 to vector<4x16xf32>
    %53 = arith.mulf %51, %52 : vector<4x16xf32>
    %cst_35 = arith.constant dense<0xFF800000> : vector<16xf32>
    %54 = vector.multi_reduction <maximumf>, %53, %cst_35 [0] : vector<4x16xf32> to vector<16xf32>
    %55 = vector.shape_cast %54 : vector<16xf32> to vector<1x16xf32>
    %56 = vector.broadcast %55 : vector<1x16xf32> to vector<4x16xf32>
    %57 = arith.subf %53, %56 : vector<4x16xf32>
    %58 = math.exp %57 : vector<4x16xf32>
    %cst_36 = arith.constant dense<0.000000e+00> : vector<16xf32>
    %59 = vector.multi_reduction <add>, %58, %cst_36 [0] : vector<4x16xf32> to vector<16xf32>
    %60 = vector.shape_cast %59 : vector<16xf32> to vector<1x16xf32>
    %61 = tpu.reciprocal %60 {approx = true} : vector<1x16xf32> -> vector<1x16xf32>
    %62 = vector.broadcast %61 : vector<1x16xf32> to vector<4x16xf32>
    %63 = arith.mulf %58, %62 : vector<4x16xf32>
    %64 = vector.extract_strided_slice %14 {offsets = [1, 0], sizes = [1, 16], strides = [1, 1]} : vector<2x16xf32> to vector<1x16xf32>
    %cst_37 = arith.constant 5.000000e-01 : f32
    %65 = vector.broadcast %cst_37 : f32 to vector<1x16xf32>
    %66 = arith.mulf %64, %65 : vector<1x16xf32>
    %67 = vector.broadcast %66 : vector<1x16xf32> to vector<4x16xf32>
    %68 = arith.mulf %63, %67 : vector<4x16xf32>
    %69 = arith.addf %48, %68 : vector<4x16xf32>
    %c0_38 = arith.constant 0 : index
    %c0_39 = arith.constant 0 : index
    %70 = vector.load %arg12[%c0_38, %c0_39] : memref<4x16xf32, #tpu.memory_space<vmem>>, vector<4x16xf32>
    tpu.vector_store %arg12[%c0_38, %c0_39], %69 {strides = array<i32>} : memref<4x16xf32, #tpu.memory_space<vmem>>, vector<4x16xf32>,
    return
  }
  func.func @transform_0(%arg0: i32) -> (i32, i32) {
    %c0_i32 = arith.constant 0 : i32
    %c0_i32_0 = arith.constant 0 : i32
    return %c0_i32, %arg0 : i32, i32
  }
  func.func @transform_1(%arg0: i32) -> (i32, i32) {
    %c0_i32 = arith.constant 0 : i32
    %c0_i32_0 = arith.constant 0 : i32
    return %c0_i32, %arg0 : i32, i32
  }
  func.func @transform_2(%arg0: i32) -> (i32, i32) {
    %c0_i32 = arith.constant 0 : i32
    %c0_i32_0 = arith.constant 0 : i32
    %c0_i32_1 = arith.constant 0 : i32
    return %c0_i32, %c0_i32_0 : i32, i32
  }
  func.func @transform_3(%arg0: i32) -> (i32, i32) {
    %c0_i32 = arith.constant 0 : i32
    %c0_i32_0 = arith.constant 0 : i32
    %c0_i32_1 = arith.constant 0 : i32
    return %c0_i32, %c0_i32_0 : i32, i32
  }
  func.func @transform_4(%arg0: i32) -> (i32, i32) {
    %c0_i32 = arith.constant 0 : i32
    %c0_i32_0 = arith.constant 0 : i32
    %c0_i32_1 = arith.constant 0 : i32
    return %c0_i32, %c0_i32_0 : i32, i32
  }
  func.func @transform_5(%arg0: i32) -> (i32, i32) {
    %c0_i32 = arith.constant 0 : i32
    %c0_i32_0 = arith.constant 0 : i32
    %c0_i32_1 = arith.constant 0 : i32
    return %c0_i32, %c0_i32_0 : i32, i32
  }
  func.func @transform_6(%arg0: i32) -> (i32, i32) {
    %c0_i32 = arith.constant 0 : i32
    %c0_i32_0 = arith.constant 0 : i32
    %c0_i32_1 = arith.constant 0 : i32
    return %c0_i32, %c0_i32_0 : i32, i32
  }
  func.func @transform_7(%arg0: i32) -> (i32, i32) {
    %c0_i32 = arith.constant 0 : i32
    %c0_i32_0 = arith.constant 0 : i32
    %c0_i32_1 = arith.constant 0 : i32
    return %c0_i32, %c0_i32_0 : i32, i32
  }
  func.func @transform_8(%arg0: i32) -> (i32, i32) {
    %c0_i32 = arith.constant 0 : i32
    %c0_i32_0 = arith.constant 0 : i32
    %c0_i32_1 = arith.constant 0 : i32
    return %c0_i32, %c0_i32_0 : i32, i32
  }
  func.func @transform_9(%arg0: i32) -> (i32, i32) {
    %c0_i32 = arith.constant 0 : i32
    %c0_i32_0 = arith.constant 0 : i32
    %c0_i32_1 = arith.constant 0 : i32
    return %c0_i32, %c0_i32_0 : i32, i32
  }
  func.func @transform_10(%arg0: i32) -> (i32, i32) {
    %c0_i32 = arith.constant 0 : i32
    %c0_i32_0 = arith.constant 0 : i32
    %c0_i32_1 = arith.constant 0 : i32
    return %c0_i32, %c0_i32_0 : i32, i32
  }
  func.func @transform_11(%arg0: i32) -> (i32, i32) {
    %c0_i32 = arith.constant 0 : i32
    %c0_i32_0 = arith.constant 0 : i32
    return %c0_i32, %arg0 : i32, i32
  }
}

</mosaic_0001>

<bundles_post_ra>
// kernel: tpu_custom_call.1
= control target key start
LH: loop header
LB: loop body
LE: loop exit
PB: predicated region body
PF: predicated region fallthrough
CT: control target
= control target key end

     0   :  { %v711_v3 = vmov 0   ;;  %vm79_vm0 = vcmask 261120   ;;  %s1012_s0 = inlined_call_operand.vmem [shape: f32[32,16], index: 0, kind: input, shape index: {}]   ;;  %s1013_s1 = inlined_call_operand.vmem [shape: f32[64,16], index: 1, kind: input, shape index: {}]   ;;  %s1014_s2 = inlined_call_operand.vmem [shape: f32[64,32], index: 2, kind: input, shape index: {}]   ;;  %s1015_s3 = inlined_call_operand.vmem [shape: f32[64,1], index: 3, kind: input, shape index: {}]   ;;  %s1016_s4 = inlined_call_operand.vmem [shape: f32[64,64], index: 4, kind: input, shape index: {}]   ;;  %s1017_s5 = inlined_call_operand.vmem [shape: f32[128,64], index: 5, kind: input, shape index: {}]   ;;  %s1018_s6 = inlined_call_operand.vmem [shape: f32[4,64], index: 6, kind: input, shape index: {}]   ;;  %s1019_s7 = inlined_call_operand.vmem [shape: f32[32,32], index: 7, kind: input, shape index: {}]   ;;  %s1020_s8 = inlined_call_operand.vmem [shape: f32[32,1], index: 8, kind: input, shape index: {}]   ;;  %s1021_s9 = inlined_call_operand.vmem [shape: f32[2,32], index: 9, kind: input, shape index: {}]   ;;  %s1022_s10 = inlined_call_operand.vmem [shape: f32[2,1], index: 10, kind: input, shape index: {}]   ;;  %s1023_s11 = inlined_call_operand.hbm [shape: f32[4,16], index: 11, kind: output, shape index: {}]  }
   0x1   :  { %v42_v0 = vld [vmem:[%s1012_s0 + $0x18] sm:$0xff]  ;;  %v41_v1 = vld [vmem:[%s1012_s0 + $0x10] sm:$0xff]  ;;  %v40_v2 = vld [vmem:[%s1012_s0 + $0x8] sm:$0xff]  ;;  %675 = vset.pattern.permute.xlu1 %v711_v3  ;;  %674 = vset.pattern.permute.xlu0 %v711_v3 }
   0x2   :  { %652 = vmatpush.msra.mxu3 %v42_v0  ;;  %248 = vmatpush.msra.mxu2 %v42_v0  ;;  %v169_v4 = vld [vmem:[%s1015_s3 + $0x28] sm:$0xff]  ;;  %v171_v5 = vld [vmem:[%s1015_s3 + $0x38] sm:$0xff]  ;;  %v39_v6 = vld [vmem:[%s1012_s0] sm:$0xff] }
   0x3   :  { %199 = vperm.xlu1 %675, %v169_v4   ;;  %209 = vperm.xlu0 %674, %v171_v5   ;;  %v53_v7 = vld [vmem:[%s1019_s7 + $0x10] sm:$0xff]  ;;  %v156_v8 = vld [vmem:[%s1014_s2] sm:$0xff]  ;;  %v167_v9 = vld [vmem:[%s1015_s3 + $0x18] sm:$0xff] }
   0x4   :  { %653 = vmatpush.msra.mxu3 %v41_v1  ;;  %249 = vmatpush.msra.mxu2 %v41_v1 }
   0x5   :  { %104 = vmatpush.msra.mxu0 %v42_v0  ;;  %676 = vset.pattern.permute.xlu2 %v711_v3 }
   0x6   :  { %654 = vmatpush.msra.mxu3 %v40_v2  ;;  %250 = vmatpush.msra.mxu2 %v40_v2 }
   0x8   :  { %655 = vmatpush.msra.mxu3 %v39_v6  ;;  %251 = vmatpush.msra.mxu2 %v39_v6 }
   0x9   :  { %16 = vsyncpa [#allocation3], 0  ;;  %615 = vmatmul.msk.f32.vlgmr.msra.gmra.mxu3 %vm79_vm0, %v53_v7  ;;  %618 = vmatmul.msk.f32.vlgmr.msra.gmra.mxu2 %vm79_vm0, %v156_v8  ;;  %v168_v10 = vld [vmem:[%s1015_s3 + $0x20] sm:$0xff]  ;;  %v170_v11 = vld [vmem:[%s1015_s3 + $0x30] sm:$0xff]  ;;  %vm293_vm1 = vcmask 523264   ;;  %vm521_vm2 = vcmask 125952  }
   0xa   :  { %105 = vmatpush.msra.mxu0 %v41_v1  ;;  %189 = vperm.xlu2 %676, %v167_v9   ;;  %v51_v12 = vld [vmem:[%s1019_s7] sm:$0xff]  ;;  %v54_v13 = vld [vmem:[%s1019_s7 + $0x18] sm:$0xff]  ;;  %v157_v14 = vld [vmem:[%s1014_s2 + $0x8] sm:$0xff]  ;;  %s604_s22 = sshll.u32 %s1023_s11, 4  ;;  %s605_s22 = int_to_ptr.hbm [resolvable:$true] %s604_s22 }
   0xb   :  { %194 = vperm.xlu1 %675, %v168_v10   ;;  %204 = vperm.xlu0 %674, %v170_v11   ;;  %v166_v15 = vld [vmem:[%s1015_s3 + $0x10] sm:$0xff]  ;;  %v164_v16 = vld [vmem:[%s1015_s3] sm:$0xff]  ;;  %v165_v17 = vld [vmem:[%s1015_s3 + $0x8] sm:$0xff] }
   0xc   :  { %106 = vmatpush.msra.mxu0 %v40_v2  ;;  %v52_v18 = vld [vmem:[%s1019_s7 + $0x8] sm:$0xff]  ;;  %v158_v19 = vld [vmem:[%s1014_s2 + $0x10] sm:$0xff]  ;;  %v58_v20 = vld [vmem:[%s1020_s8 + $0x18] sm:$0xff] }
   0xd   :  { %v57_v21 = vld [vmem:[%s1020_s8 + $0x10] sm:$0xff]  ;;  %v56_v22 = vld [vmem:[%s1020_s8 + $0x8] sm:$0xff]  ;;  %v159_v23 = vld [vmem:[%s1014_s2 + $0x18] sm:$0xff] }
   0xe   :  { %107 = vmatpush.msra.mxu0 %v39_v6  ;;  %v55_v24 = vld [vmem:[%s1020_s8] sm:$0xff]  ;;  %v161_v27 = vld [vmem:[%s1014_s2 + $0x28] sm:$0xff]  ;;  %v162_v28 = vld [vmem:[%s1014_s2 + $0x30] sm:$0xff] }
   0xf   :  { %613 = vmatmul.msk.f32.vlgmr.msra.gmra.mxu0 %vm79_vm0, %v51_v12  ;;  %v126_v25 = vld [vmem:[%s1022_s10] sm:$0x3]  ;;  %v163_v29 = vld [vmem:[%s1014_s2 + $0x38] sm:$0xff] }
  0x10   :  { %v160_v26 = vld [vmem:[%s1014_s2 + $0x20] sm:$0xff] }
  0x11   :  { %616 = vmatmul.msk.f32.gmra.mxu3 %vm79_vm0, %v54_v13  ;;  %619 = vmatmul.msk.f32.gmra.mxu2 %vm79_vm0, %v157_v14  ;;  %v125_v58 = vld [vmem:[%s1021_s9] sm:$0x3] }
  0x12   :  { %184 = vperm.xlu2 %676, %v166_v15   ;;  %v285_v15 = vld [vmem:[%s1016_s4] sm:$0xff] }
  0x13   :  { %174 = vperm.xlu1 %675, %v164_v16   ;;  %179 = vperm.xlu0 %674, %v165_v17   ;;  %v286_v16 = vld [vmem:[%s1016_s4 + $0x8] sm:$0xff]  ;;  %v287_v17 = vld [vmem:[%s1016_s4 + $0x10] sm:$0xff] }
  0x17   :  { %614 = vmatmul.msk.f32.gmra.mxu0 %vm79_vm0, %v52_v18  ;;  %v288_v18 = vld [vmem:[%s1016_s4 + $0x18] sm:$0xff] }
  0x19   :  { %620 = vmatmul.msk.f32.gmra.mxu2 %vm79_vm0, %v158_v19  ;;  %v289_v19 = vld [vmem:[%s1016_s4 + $0x20] sm:$0xff] }
  0x1a   :  { %76 = vperm.xlu2 %676, %v58_v20   ;;  %v290_v20 = vld [vmem:[%s1016_s4 + $0x28] sm:$0xff] }
  0x1b   :  { %71 = vperm.xlu0 %674, %v57_v21   ;;  %66 = vperm.xlu1 %675, %v56_v22   ;;  %v291_v21 = vld [vmem:[%s1016_s4 + $0x30] sm:$0xff]  ;;  %v292_v22 = vld [vmem:[%s1016_s4 + $0x38] sm:$0xff] }
  0x21   :  { %621 = vmatmul.msk.f32.gmra.mxu2 %vm79_vm0, %v159_v23 }
  0x22   :  { %61 = vperm.xlu2 %676, %v55_v24  }
  0x23   :  { %129 = vperm.xlu0 %674, %v126_v25  }
  0x29   :  { %622 = vmatmul.msk.f32.gmra.mxu2 %vm79_vm0, %v160_v26 }
  0x31   :  { %623 = vmatmul.msk.f32.gmra.mxu2 %vm79_vm0, %v161_v27 }
  0x39   :  { %624 = vmatmul.msk.f32.gmra.mxu2 %vm79_vm0, %v162_v28 }
  0x41   :  { %625 = vmatmul.msk.f32.gmra.mxu2 %vm79_vm0, %v163_v29 }
  0x64   :  { %v190_v30 = vpop.permute.xlu2 %189 }
  0x6c   :  { %v185_v34 = vpop.permute.xlu2 %184 }
  0x74   :  { %v77_v37 = vpop.permute.xlu2 %76 }
  0x75   :  { %v200_v31 = vpop.permute.xlu1 %199  ;;  %v210_v32 = vpop.permute.xlu0 %209 }
  0x7c   :  { %v62_v46 = vpop.permute.xlu2 %61 }
  0x7d   :  { %v205_v33 = vpop.permute.xlu0 %204  ;;  %v195_v35 = vpop.permute.xlu1 %194 }
  0x85   :  { %v180_v36 = vpop.permute.xlu0 %179  ;;  %v175_v38 = vpop.permute.xlu1 %174 }
  0x8c   :  { %v115_v39 = vpop.f32.mrf.mxu3  ;;  %v253_v40 = vpop.f32.mrf.mxu2 }
  0x8d   :  { %v254_v41 = vadd.f32 %v253_v40, %v175_v38  ;;  %v109_v42 = vpop.f32.mrf.mxu0  ;;  %v72_v43 = vpop.permute.xlu0 %71  ;;  %v361_v38 = vld [vmem:[%s1017_s5 + $0x10] sm:$0xff]  ;;  %v366_v40 = vld [vmem:[%s1017_s5 + $0x38] sm:$0xff] }
  0x8e   :  { %v116_v44 = vadd.f32 %v115_v39, %v72_v43  ;;  %v67_v45 = vpop.permute.xlu1 %66  ;;  %v110_v54 = vadd.f32 %v109_v42, %v62_v46  ;;  %v374_v39 = vld [vmem:[%s1017_s5 + $0x78] sm:$0xff]  ;;  %v367_v42 = vld [vmem:[%s1017_s5 + $0x40] sm:$0xff]  ;;  %v368_v43 = vld [vmem:[%s1017_s5 + $0x48] sm:$0xff] }
  0x8f   :  { %v277_v14 = vmax.f32 %v254_v41, 0.0  ;;  %v362_v41 = vld [vmem:[%s1017_s5 + $0x18] sm:$0xff]  ;;  %v371_v46 = vld [vmem:[%s1017_s5 + $0x60] sm:$0xff] }
  0x90   :  { %v123_v52 = vmax.f32 %v116_v44, 0.0  ;;  %v121_v56 = vmax.f32 %v110_v54, 0.0  ;;  %v369_v44 = vld [vmem:[%s1017_s5 + $0x50] sm:$0xff] }
  0x94   :  { %v118_v47 = vpop.f32.mrf.mxu3  ;;  %v256_v48 = vpop.f32.mrf.mxu2 }
  0x95   :  { %v112_v49 = vpop.f32.mrf.mxu0  ;;  %v119_v50 = vadd.f32 %v118_v47, %v77_v37  ;;  %v257_v10 = vadd.f32 %v256_v48, %v180_v36  ;;  %v373_v36 = vld [vmem:[%s1017_s5 + $0x70] sm:$0xff] }
  0x96   :  { %v113_v51 = vadd.f32 %v112_v49, %v67_v45  ;;  %v365_v37 = vld [vmem:[%s1017_s5 + $0x30] sm:$0xff]  ;;  %v370_v45 = vld [vmem:[%s1017_s5 + $0x58] sm:$0xff] }
  0x97   :  { %v124_v53 = vmax.f32 %v119_v50, 0.0  ;;  %v278_v13 = vmax.f32 %v257_v10, 0.0 }
  0x98   :  { %v122_v55 = vmax.f32 %v113_v51, 0.0 }
  0x99   :  { %147 = vmatpush.msra.mxu1 %v124_v53 }
  0x9b   :  { %148 = vmatpush.msra.mxu1 %v123_v52 }
  0x9c   :  { %v259_v57 = vpop.f32.mrf.mxu2 }
  0x9d   :  { %149 = vmatpush.msra.mxu1 %v122_v55  ;;  %v260_v8 = vadd.f32 %v259_v57, %v185_v34  ;;  %v364_v34 = vld [vmem:[%s1017_s5 + $0x28] sm:$0xff]  ;;  %v50_v55 = vld [vmem:[%s1013_s1 + $0x38] sm:$0xff] }
  0x9f   :  { %150 = vmatpush.msra.mxu1 %v121_v56  ;;  %v279_v12 = vmax.f32 %v260_v8, 0.0  ;;  %v49_v56 = vld [vmem:[%s1013_s1 + $0x30] sm:$0xff] }
  0xa0   :  { %617 = vmatmul.msk.f32.vlgmr.msra.gmra.mxu1 %vm79_vm0, %v125_v58 }
  0xa4   :  { %v262_v59 = vpop.f32.mrf.mxu2 }
  0xa5   :  { %v263_v6 = vadd.f32 %v262_v59, %v190_v30  ;;  %v48_v59 = vld [vmem:[%s1013_s1 + $0x28] sm:$0xff] }
  0xa7   :  { %v280_v11 = vmax.f32 %v263_v6, 0.0 }
  0xac   :  { %v265_v60 = vpop.f32.mrf.mxu2 }
  0xad   :  { %v266_v4 = vadd.f32 %v265_v60, %v195_v35  ;;  %v360_v35 = vld [vmem:[%s1017_s5 + $0x8] sm:$0xff] }
  0xaf   :  { %v281_v9 = vmax.f32 %v266_v4, 0.0 }
  0xb4   :  { %v268_v61 = vpop.f32.mrf.mxu2 }
  0xb5   :  { %v269_v2 = vadd.f32 %v268_v61, %v200_v31  ;;  %v363_v31 = vld [vmem:[%s1017_s5 + $0x20] sm:$0xff] }
  0xb7   :  { %v282_v7 = vmax.f32 %v269_v2, 0.0  ;;  %v45_v2 = vld [vmem:[%s1013_s1 + $0x10] sm:$0xff] }
  0xbc   :  { %v271_v62 = vpop.f32.mrf.mxu2 }
  0xbd   :  { %v272_v0 = vadd.f32 %v271_v62, %v205_v33  ;;  %v372_v33 = vld [vmem:[%s1017_s5 + $0x68] sm:$0xff]  ;;  %v47_v62 = vld [vmem:[%s1013_s1 + $0x20] sm:$0xff] }
  0xbf   :  { %v283_v5 = vmax.f32 %v272_v0, 0.0 }
  0xc4   :  { %v274_v63 = vpop.f32.mrf.mxu2 }
  0xc5   :  { %v275_v1 = vadd.f32 %v274_v63, %v210_v32  ;;  %v359_v32 = vld [vmem:[%s1017_s5] sm:$0xff]  ;;  %v46_v63 = vld [vmem:[%s1013_s1 + $0x18] sm:$0xff] }
  0xc7   :  { %v284_v3 = vmax.f32 %v275_v1, 0.0 }
  0xc9   :  { %326 = vmatpush.msrb.mxu3 %v284_v3 }
  0xcb   :  { %327 = vmatpush.msrb.mxu3 %v283_v5  ;;  %v44_v5 = vld [vmem:[%s1013_s1 + $0x8] sm:$0xff] }
  0xcd   :  { %328 = vmatpush.msrb.mxu3 %v282_v7 }
  0xcf   :  { %329 = vmatpush.msrb.mxu3 %v281_v9  ;;  %v43_v9 = vld [vmem:[%s1013_s1] sm:$0xff]  ;;  %s712_s1 = smov [#allocation2]  }
  0xd1   :  { %330 = vmatpush.msrb.mxu3 %v280_v11 }
  0xd3   :  { %331 = vmatpush.msrb.mxu3 %v279_v12  ;;  %v488_v12 = vld [vmem:[%s1018_s6] sm:$0xf]  ;;  %s602_s6 = sshll.u32 %s712_s1, 4  ;;  %s603_s6 = int_to_ptr.vmem [resolvable:$true] %s602_s6 }
  0xd5   :  { %332 = vmatpush.msrb.mxu3 %v278_v13 }
  0xd7   :  { %333 = vmatpush.msrb.mxu3 %v277_v14 }
  0xd8   :  { %626 = vmatmul.msk.f32.vlgmr.msrb.gmra.mxu3 %vm293_vm1, %v285_v15 }
  0xe0   :  { %627 = vmatmul.msk.f32.gmra.mxu3 %vm293_vm1, %v286_v16 }
  0xe8   :  { %628 = vmatmul.msk.f32.gmra.mxu3 %vm293_vm1, %v287_v17 }
  0xf0   :  { %629 = vmatmul.msk.f32.gmra.mxu3 %vm293_vm1, %v288_v18 }
  0xf8   :  { %630 = vmatmul.msk.f32.gmra.mxu3 %vm293_vm1, %v289_v19 }
 0x100   :  { %631 = vmatmul.msk.f32.gmra.mxu3 %vm293_vm1, %v290_v20 }
 0x108   :  { %632 = vmatmul.msk.f32.gmra.mxu3 %vm293_vm1, %v291_v21 }
 0x110   :  { %633 = vmatmul.msk.f32.gmra.mxu3 %vm293_vm1, %v292_v22 }
 0x11d   :  { %v972_v47 = vpop.f32.mrf.mxu1 }
 0x15b   :  { %v335_v23 = vpop.f32.mrf.mxu3 }
 0x163   :  { %v338_v24 = vpop.f32.mrf.mxu3 }
 0x16b   :  { %v341_v25 = vpop.f32.mrf.mxu3 }
 0x173   :  { %v344_v26 = vpop.f32.mrf.mxu3 }
 0x17b   :  { %v347_v27 = vpop.f32.mrf.mxu3 }
 0x183   :  { %v350_v28 = vpop.f32.mrf.mxu3 }
 0x18b   :  { %v353_v29 = vpop.f32.mrf.mxu3 }
 0x193   :  { %v356_v30 = vpop.f32.mrf.mxu3 }
 0x194   :  { %431 = vmatpush.msrb.mxu0 %v356_v30  ;;  %656 = vmatpush.msrb.mxu1 %v356_v30 }
 0x195   :  { %657 = vmatpush.msrb.mxu2 %v356_v30 }
 0x196   :  { %432 = vmatpush.msrb.mxu0 %v353_v29  ;;  %658 = vmatpush.msrb.mxu1 %v353_v29 }
 0x197   :  { %659 = vmatpush.msrb.mxu2 %v353_v29 }
 0x198   :  { %433 = vmatpush.msrb.mxu0 %v350_v28  ;;  %660 = vmatpush.msrb.mxu1 %v350_v28 }
 0x199   :  { %661 = vmatpush.msrb.mxu2 %v350_v28 }
 0x19a   :  { %434 = vmatpush.msrb.mxu0 %v347_v27  ;;  %662 = vmatpush.msrb.mxu1 %v347_v27 }
 0x19b   :  { %663 = vmatpush.msrb.mxu2 %v347_v27 }
 0x19c   :  { %435 = vmatpush.msrb.mxu0 %v344_v26  ;;  %664 = vmatpush.msrb.mxu1 %v344_v26 }
 0x19d   :  { %665 = vmatpush.msrb.mxu2 %v344_v26 }
 0x19e   :  { %436 = vmatpush.msrb.mxu0 %v341_v25  ;;  %666 = vmatpush.msrb.mxu1 %v341_v25 }
 0x19f   :  { %667 = vmatpush.msrb.mxu2 %v341_v25 }
 0x1a0   :  { %437 = vmatpush.msrb.mxu0 %v338_v24  ;;  %668 = vmatpush.msrb.mxu1 %v338_v24 }
 0x1a1   :  { %669 = vmatpush.msrb.mxu2 %v338_v24 }
 0x1a2   :  { %438 = vmatpush.msrb.mxu0 %v335_v23  ;;  %670 = vmatpush.msrb.mxu1 %v335_v23 }
 0x1a3   :  { %671 = vmatpush.msrb.mxu2 %v335_v23  ;;  %638 = vmatmul.msk.f32.vlgmr.msrb.gmra.mxu1 %vm293_vm1, %v363_v31 }
 0x1a4   :  { %634 = vmatmul.msk.f32.vlgmr.msrb.gmra.mxu0 %vm293_vm1, %v359_v32  ;;  %647 = vmatmul.msk.f32.vlgmr.msrb.gmra.mxu2 %vm293_vm1, %v372_v33 }
 0x1ab   :  { %639 = vmatmul.msk.f32.gmra.mxu1 %vm293_vm1, %v364_v34 }
 0x1ac   :  { %635 = vmatmul.msk.f32.gmra.mxu0 %vm293_vm1, %v360_v35  ;;  %648 = vmatmul.msk.f32.gmra.mxu2 %vm293_vm1, %v373_v36 }
 0x1b3   :  { %640 = vmatmul.msk.f32.gmra.mxu1 %vm293_vm1, %v365_v37 }
 0x1b4   :  { %636 = vmatmul.msk.f32.gmra.mxu0 %vm293_vm1, %v361_v38  ;;  %649 = vmatmul.msk.f32.gmra.mxu2 %vm293_vm1, %v374_v39 }
 0x1bb   :  { %641 = vmatmul.msk.f32.gmra.mxu1 %vm293_vm1, %v366_v40 }
 0x1bc   :  { %637 = vmatmul.msk.f32.gmra.mxu0 %vm293_vm1, %v362_v41 }
 0x1c3   :  { %642 = vmatmul.msk.f32.gmra.mxu1 %vm293_vm1, %v367_v42 }
 0x1cb   :  { %643 = vmatmul.msk.f32.gmra.mxu1 %vm293_vm1, %v368_v43 }
 0x1d3   :  { %644 = vmatmul.msk.f32.gmra.mxu1 %vm293_vm1, %v369_v44 }
 0x1db   :  { %645 = vmatmul.msk.f32.gmra.mxu1 %vm293_vm1, %v370_v45 }
 0x1e3   :  { %646 = vmatmul.msk.f32.gmra.mxu1 %vm293_vm1, %v371_v46 }
 0x220   :  { %v452_v48 = vpop.f32.mrf.mxu1 }
 0x221   :  { %v440_v49 = vpop.f32.mrf.mxu0  ;;  %v493_v3 = vmul.f32 %v452_v48, %v47_v62 }
 0x222   :  { %v489_v11 = vmul.f32 %v440_v49, %v43_v9 }
 0x227   :  { %v479_v53 = vpop.f32.mrf.mxu2 }
 0x228   :  { %v455_v50 = vpop.f32.mrf.mxu1  ;;  %v550_v16 = vmul.f32 %v479_v53, %v48_v59 }
 0x229   :  { %v443_v51 = vpop.f32.mrf.mxu0  ;;  %v494_v1 = vmul.f32 %v455_v50, %v48_v59 }
 0x22a   :  { %v490_v8 = vmul.f32 %v443_v51, %v44_v5 }
 0x22f   :  { %v482_v60 = vpop.f32.mrf.mxu2 }
 0x230   :  { %v458_v52 = vpop.f32.mrf.mxu1  ;;  %v551_v15 = vmul.f32 %v482_v60, %v49_v56 }
 0x231   :  { %v446_v54 = vpop.f32.mrf.mxu0  ;;  %v495_v61 = vmul.f32 %v458_v52, %v49_v56 }
 0x232   :  { %v491_v7 = vmul.f32 %v446_v54, %v45_v2 }
 0x237   :  { %v485_v10 = vpop.f32.mrf.mxu2 }
 0x238   :  { %v461_v57 = vpop.f32.mrf.mxu1  ;;  %v552_v13 = vmul.f32 %v485_v10, %v50_v55 }
 0x239   :  { %v496_v58 = vmul.f32 %v461_v57, %v50_v55  ;;  %v449_v0 = vpop.f32.mrf.mxu0 }
 0x23a   :  { %v492_v4 = vmul.f32 %v449_v0, %v46_v63 }
 0x23b   :  { %508 = vmatpush.msra.mxu0 %v496_v58 }
 0x23d   :  { %509 = vmatpush.msra.mxu0 %v495_v61  ;;  %v130_v61 = vpop.permute.xlu0 %129 }
 0x23f   :  { %510 = vmatpush.msra.mxu0 %v494_v1 }
 0x240   :  { %v464_v6 = vpop.f32.mrf.mxu1 }
 0x241   :  { %511 = vmatpush.msra.mxu0 %v493_v3  ;;  %v545_v24 = vmul.f32 %v464_v6, %v43_v9 }
 0x243   :  { %512 = vmatpush.msra.mxu0 %v492_v4 }
 0x245   :  { %513 = vmatpush.msra.mxu0 %v491_v7 }
 0x247   :  { %514 = vmatpush.msra.mxu0 %v490_v8 }
 0x248   :  { %v467_v14 = vpop.f32.mrf.mxu1 }
 0x249   :  { %515 = vmatpush.msra.mxu0 %v489_v11  ;;  %v546_v23 = vmul.f32 %v467_v14, %v44_v5 }
 0x24a   :  { %650 = vmatmul.msk.f32.vlgmr.msra.gmra.mxu0 %vm293_vm1, %v488_v12 }
 0x24b   :  { %561 = vmatpush.msrb.mxu0 %v552_v13 }
 0x24d   :  { %562 = vmatpush.msrb.mxu0 %v551_v15 }
 0x24f   :  { %563 = vmatpush.msrb.mxu0 %v550_v16 }
 0x250   :  { %v470_v17 = vpop.f32.mrf.mxu1 }
 0x251   :  { %v547_v22 = vmul.f32 %v470_v17, %v45_v2 }
 0x258   :  { %v473_v18 = vpop.f32.mrf.mxu1 }
 0x259   :  { %v548_v21 = vmul.f32 %v473_v18, %v46_v63  ;;  %v153_v63 = vadd.f32 %v972_v47, %v130_v61 }
 0x25b   :  { %v155_v2 = vand.u32 2147483647, %v153_v63 }
 0x25d   :  { %v541_v4 = vmul.f32 0.5, %v155_v2 }
 0x25f   :  { %v542_v7 = vperm.slane %v541_v4, 0  ;;  %v593_v8 = vperm.slane %v541_v4, 1 }
 0x260   :  { %v476_v19 = vpop.f32.mrf.mxu1 }
 0x261   :  { %v549_v20 = vmul.f32 %v476_v19, %v47_v62 }
 0x263   :  { %564 = vmatpush.msrb.mxu0 %v549_v20 }
 0x265   :  { %565 = vmatpush.msrb.mxu0 %v548_v21 }
 0x267   :  { %566 = vmatpush.msrb.mxu0 %v547_v22 }
 0x269   :  { %567 = vmatpush.msrb.mxu0 %v546_v23 }
 0x26b   :  { %568 = vmatpush.msrb.mxu0 %v545_v24 }
 0x26c   :  { %651 = vmatmul.msk.f32.vlgmr.msrb.gmra.mxu0 %vm293_vm1, %v488_v12 }
 0x2c7   :  { %v517_v25 = vpop.f32.mrf.mxu0 }
 0x2c8   :  { %v520_v26 = vmul.f32 0.17677669, %v517_v25 }
 0x2ca   :  { %v522_v27 = vsel %vm521_vm2, %v520_v26, -inf }
 0x2cb   :  { %v523_v28 = vrot.slane %v522_v27, 4 }
 0x2cd   :  { %v524_v29 = vmax.f32 %v522_v27, %v523_v28 }
 0x2cf   :  { %v525_v30 = vrot.slane %v524_v29, 2 }
 0x2d1   :  { %v526_v31 = vmax.f32 %v524_v29, %v525_v30 }
 0x2d3   :  { %v527_v32 = vrot.slane %v526_v31, 1 }
 0x2d5   :  { %v528_v33 = vmax.f32 %v526_v31, %v527_v32 }
 0x2d7   :  { %v529_v34 = vsub.f32 %v520_v26, %v528_v33 }
 0x2d9   :  { %v530_v35 = vmul.f32 1.442695, %v529_v34 }
 0x2db   :  { %677 = vpow2.f32 %v530_v35 }
 0x2e1   :  { %v678_v40 = vpop.eup %677 }
 0x2e2   :  { %v532_v43 = vsel %vm521_vm2, %v678_v40, 0.0 }
 0x2e3   :  { %v533_v45 = vrot.slane %v532_v43, 4 }
 0x2e5   :  { %v534_v49 = vadd.f32 %v533_v45, %v532_v43 }
 0x2e7   :  { %v535_v52 = vrot.slane %v534_v49, 2 }
 0x2e9   :  { %v570_v36 = vpop.f32.mrf.mxu0  ;;  %v536_v53 = vadd.f32 %v535_v52, %v534_v49 }
 0x2ea   :  { %v573_v37 = vmul.f32 0.17677669, %v570_v36 }
 0x2eb   :  { %v537_v56 = vrot.slane %v536_v53, 1 }
 0x2ec   :  { %v574_v38 = vsel %vm521_vm2, %v573_v37, -inf }
 0x2ed   :  { %v575_v39 = vrot.slane %v574_v38, 4  ;;  %v538_v59 = vadd.f32 %v537_v56, %v536_v53 }
 0x2ef   :  { %v576_v41 = vmax.f32 %v574_v38, %v575_v39 }
 0x2f1   :  { %v577_v42 = vrot.slane %v576_v41, 2 }
 0x2f3   :  { %v578_v44 = vmax.f32 %v576_v41, %v577_v42 }
 0x2f5   :  { %v579_v46 = vrot.slane %v578_v44, 1 }
 0x2f7   :  { %v580_v48 = vmax.f32 %v578_v44, %v579_v46 }
 0x2f9   :  { %v581_v50 = vsub.f32 %v573_v37, %v580_v48 }
 0x2fb   :  { %v582_v51 = vmul.f32 1.442695, %v581_v50 }
 0x2fd   :  { %679 = vpow2.f32 %v582_v51 }
 0x2fe   :  { %681 = vrcp.f32 %v538_v59 }
 0x303   :  { %v680_v54 = vpop.eup %679 }
 0x304   :  { %v584_v55 = vsel %vm521_vm2, %v680_v54, 0.0  ;;  %v682_v3 = vpop.eup %681 }
 0x305   :  { %v585_v57 = vrot.slane %v584_v55, 4  ;;  %v540_v5 = vmul.f32 %v682_v3, %v678_v40 }
 0x307   :  { %v586_v58 = vadd.f32 %v585_v57, %v584_v55  ;;  %v543_v10 = vmul.f32 %v542_v7, %v540_v5 }
 0x309   :  { %v587_v60 = vrot.slane %v586_v58, 2 }
 0x30b   :  { %v588_v62 = vadd.f32 %v587_v60, %v586_v58 }
 0x30d   :  { %v589_v0 = vrot.slane %v588_v62, 1 }
 0x30f   :  { %v590_v1 = vadd.f32 %v589_v0, %v588_v62 }
 0x311   :  { %683 = vrcp.f32 %v590_v1 }
 0x317   :  { %v684_v6 = vpop.eup %683 }
 0x318   :  { %v592_v9 = vmul.f32 %v684_v6, %v680_v54 }
 0x31a   :  { %v594_v47 = vmul.f32 %v593_v8, %v592_v9 }
 0x31c   :  { %v595_v11 = vadd.f32 %v594_v47, %v543_v10 }
 0x31e   :  { %596 = vst.msk [vmem:[#allocation2] sm:$0xf] %vm521_vm2, %v595_v11 }
 0x31f   :  { %607 = dma.vmem_to_hbm [thread:$0]  %s603_s6, 64, %s605_s22, [#allocation3]  }
 0x320   :  { %709 = dma.done.wait [#allocation3], 64  }
 0x321   :  { %710 = vsyncadd [#allocation3], 4294967232 }
 0x322   :  { %612 = vsyncpa [#allocation3], 1 }

</bundles_post_ra>
